<compile_context>
chip_gen: v5e
topology: v5e:2x2
jax: 0.10.0
libtpu: 0.0.40
codegen_flags: <defaults>
</compile_context>

<pallas_src>
import functools

import jax
import jax.numpy as jnp
from jax import lax
from jax.experimental import pallas as pl
from jax.experimental.pallas import tpu as pltpu


_SR_TARGET = 1024   # sublane-rows per spatial block (x 128 lanes)


def _sublane_align(dtype):
    """Sublane multiple for a clean packed layout of `dtype` (8/16/32)."""
    return max(8, 32 // jnp.dtype(dtype).itemsize)


def _choose_tiling(hw, align):
    """Pick (rows-per-block, #spatial blocks, padded hw) for a per-channel stream."""
    s0 = -(-hw // 128)                      # ceil(hw / 128) sublane rows
    if s0 <= _SR_TARGET:
        ns = 1
        sr = -(-s0 // align) * align        # keep sublane dim layout-aligned
    else:
        ns = -(-s0 // _SR_TARGET)
        sr = -(-s0 // ns)
        sr = -(-sr // align) * align
    return sr, ns, sr * ns * 128


def _combo_stats_kernel(x_ref, t_ref,
                        inter_ref, ssig_ref, stgt_ref,
                        bce_ref, foc_ref, cnt_ref,
                        *, gamma, ignore_index, sr, ns, valid_hw,
                        need_dice_jac, need_bce, need_focal):
    """Accumulate ComboLoss statistics for one (channel, batch, spatial) block.

    x_ref, t_ref             : (SR, 128) logits / targets (native dtype).
    inter/ssig/stgt/bce/foc/cnt : (8, 128) per-(channel,batch) accumulators.
    """
    @pl.when(pl.program_id(2) == 0)
    def _init():
        inter_ref[...] = jnp.zeros_like(inter_ref)
        ssig_ref[...] = jnp.zeros_like(ssig_ref)
        stgt_ref[...] = jnp.zeros_like(stgt_ref)
        bce_ref[...] = jnp.zeros_like(bce_ref)
        foc_ref[...] = jnp.zeros_like(foc_ref)
        cnt_ref[...] = jnp.zeros_like(cnt_ref)

    x = x_ref[...].astype(jnp.float32)      # raw logits
    t = t_ref[...].astype(jnp.float32)      # targets

    def fold(v):
        # (SR,128) -> (8,128): sum groups of 8 sublane rows (pure vreg adds).
        return v.reshape(sr // 8, 8, 128).sum(axis=0)

    def accumulate(vmask):
        def m(v):
            return v if vmask is None else v * vmask

        if need_dice_jac or need_bce:
            e = jnp.exp(-jnp.abs(x))                        # exp(-|x|), shared

        if need_dice_jac:
            # Numerically stable sigmoid via the shared exp(-|x|).
            inv1pe = pl.reciprocal(1.0 + e, approx=True)    # 1 / (1 + exp(-|x|))
            sig = jnp.where(x >= 0.0, inv1pe, e * inv1pe)
            inter_ref[...] += fold(m(sig * t))
            ssig_ref[...] += fold(m(sig))
            stgt_ref[...] += fold(m(t))

        if need_bce:
            # StableBCELoss: max(x,0) - x*t + log(1 + exp(-|x|)).
            # (log(1+e) matches the PyTorch reference formula exactly.)
            bce = jnp.maximum(x, 0.0) - x * t + jnp.log(1.0 + e)
            bce_ref[...] += fold(m(bce))

        if need_focal:
            # FocalLoss2d on RAW (clamped) logits, ignoring targets == ignore_index
            # (faithful to the PyTorch reference quirk).
            eps = 1e-8
            oc = jnp.clip(x, eps, 1.0 - eps)
            tc = jnp.clip(t, eps, 1.0 - eps)
            pt = (1.0 - tc) * (1.0 - oc) + tc * oc
            one_m_pt = 1.0 - pt
            g = float(gamma)
            if g == int(g) and int(g) >= 0:                 # integer gamma -> multiplies
                ig = int(g)
                if ig == 0:
                    pw = jnp.ones_like(one_m_pt)
                else:
                    pw = one_m_pt
                    for _ in range(ig - 1):
                        pw = pw * one_m_pt
            else:
                pw = one_m_pt ** g
            fmask = (t != float(ignore_index)).astype(jnp.float32)
            if vmask is not None:
                fmask = fmask * vmask
            foc_ref[...] += fold((-pw * jnp.log(pt)) * fmask)
            cnt_ref[...] += fold(fmask)

    def make_mask():
        s_blk = pl.program_id(2)
        row = lax.broadcasted_iota(jnp.int32, (sr, 128), 0)
        lane = lax.broadcasted_iota(jnp.int32, (sr, 128), 1)
        flat = (s_blk * sr + row) * 128 + lane
        return (flat < valid_hw).astype(jnp.float32)

    if valid_hw is None:
        accumulate(None)                    # no padding anywhere
    elif ns == 1:
        accumulate(make_mask())             # single block holds the ragged tail
    else:
        # Only blocks whose tail extends past the valid extent need masking.
        block_end = (pl.program_id(2) + 1) * (sr * 128)
        has_padding = block_end > valid_hw

        @pl.when(has_padding)
        def _masked():
            accumulate(make_mask())

        @pl.when(jnp.logical_not(has_padding))
        def _clean():
            accumulate(None)


def _run_stats(x4, t4, *, sr, ns, gamma, ignore_index, valid_hw,
               need_dice_jac, need_bce, need_focal):
    """x4, t4: (B, C, sr*ns, 128).  Returns six (C, B, 8, 128) partial-sum slabs."""
    B, C, s_pad, L = x4.shape
    assert L == 128 and s_pad == sr * ns

    kernel = functools.partial(
        _combo_stats_kernel, gamma=gamma, ignore_index=ignore_index,
        sr=sr, ns=ns, valid_hw=valid_hw,
        need_dice_jac=need_dice_jac, need_bce=need_bce, need_focal=need_focal)

    acc = jax.ShapeDtypeStruct((C, B, 8, 128), jnp.float32)
    out_shapes = (acc, acc, acc, acc, acc, acc)

    in_spec = pl.BlockSpec((None, None, sr, 128), lambda c, b, s: (b, c, s, 0))
    acc_spec = pl.BlockSpec((None, None, 8, 128), lambda c, b, s: (c, b, 0, 0))

    grid_spec = pltpu.PrefetchScalarGridSpec(
        num_scalar_prefetch=0,
        grid=(C, B, ns),                    # C, B parallel; spatial = reduction
        in_specs=[in_spec, in_spec],
        out_specs=[acc_spec] * 6,
    )

    return pl.pallas_call(
        kernel,
        out_shape=out_shapes,
        grid_spec=grid_spec,
        compiler_params=pltpu.CompilerParams(
            dimension_semantics=("parallel", "parallel", "arbitrary"),
            vmem_limit_bytes=32 * 1024 * 1024),
    )(x4, t4)


def combo_loss(outputs, targets, weights,
               channel_weights=(1.0, 0.5, 0.5), channel_losses=None,
               gamma=2.0, ignore_index=255):
    """JAX/Pallas equivalent of ComboLoss.forward (per_image=False everywhere)."""
    B, C, H, W = outputs.shape
    hw = H * W

    for k in weights:
        if k not in ("dice", "jaccard", "bce", "focal"):
            raise ValueError(f"unknown loss key {k}")

    def _per_channel_active(k):
        if not weights.get(k, 0):
            return False
        if channel_losses is None:
            return True
        return any(k in channel_losses[c] for c in range(C))

    need_dice_jac = _per_channel_active("dice") or _per_channel_active("jaccard")
    need_bce = bool(weights.get("bce", 0))
    need_focal = bool(weights.get("focal", 0))

    # Free (row-major) reshapes only -- no HBM transpose, no wrapper dtype cast:
    # the kernel casts in-register, so bf16 logits / uint8 masks stream narrow.
    x = outputs.reshape(B, C, hw)
    t = targets.reshape(B, C, hw)

    align = max(_sublane_align(outputs.dtype), _sublane_align(targets.dtype))
    sr, ns, hw_pad = _choose_tiling(hw, align)
    if hw_pad != hw:
        pad = hw_pad - hw
        x = jnp.pad(x, ((0, 0), (0, 0), (0, pad)))
        t = jnp.pad(t, ((0, 0), (0, 0), (0, pad)))
        valid_hw = hw
    else:
        valid_hw = None

    x4 = x.reshape(B, C, sr * ns, 128)
    t4 = t.reshape(B, C, sr * ns, 128)

    inter_a, ssig_a, stgt_a, bce_a, foc_a, cnt_a = _run_stats(
        x4, t4, sr=sr, ns=ns, gamma=gamma, ignore_index=ignore_index,
        valid_hw=valid_hw, need_dice_jac=need_dice_jac,
        need_bce=need_bce, need_focal=need_focal)

    # Tiny epilogue: collapse (C, B, 8, 128) partial sums to a handful of scalars.
    inter = jnp.sum(inter_a, axis=(1, 2, 3))    # (C,)  sum(sig * t)
    ssig = jnp.sum(ssig_a, axis=(1, 2, 3))      # (C,)  sum(sig)
    stgt = jnp.sum(stgt_a, axis=(1, 2, 3))      # (C,)  sum(t)

    total = jnp.float32(0.0)
    n_elems = jnp.float32(B * C * H * W)

    for k, w in weights.items():
        if not w:
            continue
        if k == "dice":
            eps = 1e-5
            per_c = 1.0 - (2.0 * inter + eps) / (ssig + stgt + eps)
            val = jnp.float32(0.0)
            for c in range(C):
                if (channel_losses is None) or ("dice" in channel_losses[c]):
                    val = val + channel_weights[c] * per_c[c]
        elif k == "jaccard":
            eps = 1e-3
            per_c = 1.0 - (inter + eps) / (ssig + stgt - inter + eps)
            val = jnp.float32(0.0)
            for c in range(C):
                if (channel_losses is None) or ("jaccard" in channel_losses[c]):
                    val = val + channel_weights[c] * per_c[c]
        elif k == "bce":
            val = jnp.sum(bce_a) / n_elems
        else:  # "focal"
            val = jnp.sum(foc_a) / jnp.sum(cnt_a)
        total = total + w * val

    # TODO(synk): the PyTorch module also stashes per-term values in self.values;
    # that bookkeeping side effect is not reproduced here.
    return jnp.maximum(total, 1e-5)


def _reference_combo_loss(outputs, targets, weights,
                          channel_weights=(1.0, 0.5, 0.5)):
    """Pure-JAX reference mirroring the PyTorch math (for the self-check)."""
    outputs = outputs.astype(jnp.float32)
    targets = targets.astype(jnp.float32)
    sig = jax.nn.sigmoid(outputs)
    B, C, H, W = outputs.shape
    total = 0.0
    for k, w in weights.items():
        if not w:
            continue
        if k in ("dice", "jaccard"):
            val = 0.0
            for c in range(C):
                o = sig[:, c].reshape(-1)
                tt = targets[:, c].reshape(-1)
                inter = jnp.sum(o * tt)
                if k == "dice":
                    eps = 1e-5
                    l = 1.0 - (2 * inter + eps) / (jnp.sum(o) + jnp.sum(tt) + eps)
                else:
                    eps = 1e-3
                    l = 1.0 - (inter + eps) / (jnp.sum(o + tt) - inter + eps)
                val = val + channel_weights[c] * l
        elif k == "bce":
            x = outputs.reshape(-1)
            tt = targets.reshape(-1)
            val = jnp.mean(jnp.maximum(x, 0) - x * tt + jnp.log(1 + jnp.exp(-jnp.abs(x))))
        elif k == "focal":
            x = outputs.reshape(-1)
            tt = targets.reshape(-1)
            keep = tt != 255.0
            eps = 1e-8
            oc = jnp.clip(x, eps, 1 - eps)
            tc = jnp.clip(tt, eps, 1 - eps)
            pt = (1 - tc) * (1 - oc) + tc * oc
            term = -((1 - pt) ** 2) * jnp.log(pt)
            val = jnp.sum(jnp.where(keep, term, 0.0)) / jnp.sum(keep)
        total = total + w * val
    return jnp.maximum(total, 1e-5)


if __name__ == "__main__":
    key = jax.random.PRNGKey(0)
    k1, k2 = jax.random.split(key)

    B, C, H, W = 2, 3, 16, 16          # channel_weights=[1, 0.5, 0.5] implies 3 channels
    logits = jax.random.normal(k1, (B, C, H, W), dtype=jnp.float32)
    targets = (jax.random.uniform(k2, (B, C, H, W)) > 0.5).astype(jnp.float32)

    weights = {"bce": 1.0, "dice": 1.0, "focal": 2.0, "jaccard": 0.5}

    loss = jax.block_until_ready(combo_loss(logits, targets, weights))
    ref = jax.block_until_ready(_reference_combo_loss(logits, targets, weights))

    # Slightly relaxed tolerance: the kernel uses the EUP approximate reciprocal
    # for the sigmoid denominator (pl.reciprocal(approx=True)).
    assert jnp.allclose(loss, ref, rtol=2e-3, atol=1e-4), (loss, ref)

    print("KERNEL_OK")
</pallas_src>

<mosaic_0001>
module attributes {stable_mosaic.version = 11 : i64} {
  func.func @_combo_stats_kernel(%arg0: i32, %arg1: i32, %arg2: i32, %arg3: memref<1x1x8x128xf32, #tpu.memory_space<vmem>>, %arg4: memref<1x1x8x128xf32, #tpu.memory_space<vmem>>, %arg5: memref<1x1x8x128xf32, #tpu.memory_space<vmem>>, %arg6: memref<1x1x8x128xf32, #tpu.memory_space<vmem>>, %arg7: memref<1x1x8x128xf32, #tpu.memory_space<vmem>>, %arg8: memref<1x1x8x128xf32, #tpu.memory_space<vmem>>, %arg9: memref<1x1x8x128xf32, #tpu.memory_space<vmem>>, %arg10: memref<1x1x8x128xf32, #tpu.memory_space<vmem>>) attributes {dimension_semantics = [#tpu.dimension_semantics<parallel>, #tpu.dimension_semantics<parallel>, #tpu.dimension_semantics<arbitrary>], iteration_bounds = array<i64: 3, 2, 1>, scalar_prefetch = 0 : i64, scratch_operands = 0 : i64, tpu.core_type = #tpu.core_type<tc>, window_params = [{transform_indices = @transform_0, window_bounds = array<i64: 1, 1, 8, 128>}, {transform_indices = @transform_1, window_bounds = array<i64: 1, 1, 8, 128>}, {transform_indices = @transform_2, window_bounds = array<i64: 1, 1, 8, 128>}, {transform_indices = @transform_3, window_bounds = array<i64: 1, 1, 8, 128>}, {transform_indices = @transform_4, window_bounds = array<i64: 1, 1, 8, 128>}, {transform_indices = @transform_5, window_bounds = array<i64: 1, 1, 8, 128>}, {transform_indices = @transform_6, window_bounds = array<i64: 1, 1, 8, 128>}, {transform_indices = @transform_7, window_bounds = array<i64: 1, 1, 8, 128>}]} {
    %c0_i32 = arith.constant 0 : i32
    %0 = arith.cmpi eq, %arg2, %c0_i32 : i32
    %1 = arith.extui %0 : i1 to i32
    %c0_i32_0 = arith.constant 0 : i32
    %2 = arith.cmpi ne, %1, %c0_i32_0 : i32
    scf.if %2 {
      %cst_75 = arith.constant 0.000000e+00 : f32
      %119 = vector.broadcast %cst_75 : f32 to vector<8x128xf32>
      %c0_76 = arith.constant 0 : index
      %c0_77 = arith.constant 0 : index
      %c0_78 = arith.constant 0 : index
      %c0_79 = arith.constant 0 : index
      %120 = vector.load %arg5[%c0_76, %c0_77, %c0_78, %c0_79] : memref<1x1x8x128xf32, #tpu.memory_space<vmem>>, vector<1x1x8x128xf32>
      %121 = vector.shape_cast %120 : vector<1x1x8x128xf32> to vector<8x128xf32>
      %122 = vector.shape_cast %119 : vector<8x128xf32> to vector<1x1x8x128xf32>
      tpu.vector_store %arg5[%c0_76, %c0_77, %c0_78, %c0_79], %122 {strides = array<i32>} : memref<1x1x8x128xf32, #tpu.memory_space<vmem>>, vector<1x1x8x128xf32>,
      %cst_80 = arith.constant 0.000000e+00 : f32
      %123 = vector.broadcast %cst_80 : f32 to vector<8x128xf32>
      %c0_81 = arith.constant 0 : index
      %c0_82 = arith.constant 0 : index
      %c0_83 = arith.constant 0 : index
      %c0_84 = arith.constant 0 : index
      %124 = vector.load %arg6[%c0_81, %c0_82, %c0_83, %c0_84] : memref<1x1x8x128xf32, #tpu.memory_space<vmem>>, vector<1x1x8x128xf32>
      %125 = vector.shape_cast %124 : vector<1x1x8x128xf32> to vector<8x128xf32>
      %126 = vector.shape_cast %123 : vector<8x128xf32> to vector<1x1x8x128xf32>
      tpu.vector_store %arg6[%c0_81, %c0_82, %c0_83, %c0_84], %126 {strides = array<i32>} : memref<1x1x8x128xf32, #tpu.memory_space<vmem>>, vector<1x1x8x128xf32>,
      %cst_85 = arith.constant 0.000000e+00 : f32
      %127 = vector.broadcast %cst_85 : f32 to vector<8x128xf32>
      %c0_86 = arith.constant 0 : index
      %c0_87 = arith.constant 0 : index
      %c0_88 = arith.constant 0 : index
      %c0_89 = arith.constant 0 : index
      %128 = vector.load %arg7[%c0_86, %c0_87, %c0_88, %c0_89] : memref<1x1x8x128xf32, #tpu.memory_space<vmem>>, vector<1x1x8x128xf32>
      %129 = vector.shape_cast %128 : vector<1x1x8x128xf32> to vector<8x128xf32>
      %130 = vector.shape_cast %127 : vector<8x128xf32> to vector<1x1x8x128xf32>
      tpu.vector_store %arg7[%c0_86, %c0_87, %c0_88, %c0_89], %130 {strides = array<i32>} : memref<1x1x8x128xf32, #tpu.memory_space<vmem>>, vector<1x1x8x128xf32>,
      %cst_90 = arith.constant 0.000000e+00 : f32
      %131 = vector.broadcast %cst_90 : f32 to vector<8x128xf32>
      %c0_91 = arith.constant 0 : index
      %c0_92 = arith.constant 0 : index
      %c0_93 = arith.constant 0 : index
      %c0_94 = arith.constant 0 : index
      %132 = vector.load %arg8[%c0_91, %c0_92, %c0_93, %c0_94] : memref<1x1x8x128xf32, #tpu.memory_space<vmem>>, vector<1x1x8x128xf32>
      %133 = vector.shape_cast %132 : vector<1x1x8x128xf32> to vector<8x128xf32>
      %134 = vector.shape_cast %131 : vector<8x128xf32> to vector<1x1x8x128xf32>
      tpu.vector_store %arg8[%c0_91, %c0_92, %c0_93, %c0_94], %134 {strides = array<i32>} : memref<1x1x8x128xf32, #tpu.memory_space<vmem>>, vector<1x1x8x128xf32>,
      %cst_95 = arith.constant 0.000000e+00 : f32
      %135 = vector.broadcast %cst_95 : f32 to vector<8x128xf32>
      %c0_96 = arith.constant 0 : index
      %c0_97 = arith.constant 0 : index
      %c0_98 = arith.constant 0 : index
      %c0_99 = arith.constant 0 : index
      %136 = vector.load %arg9[%c0_96, %c0_97, %c0_98, %c0_99] : memref<1x1x8x128xf32, #tpu.memory_space<vmem>>, vector<1x1x8x128xf32>
      %137 = vector.shape_cast %136 : vector<1x1x8x128xf32> to vector<8x128xf32>
      %138 = vector.shape_cast %135 : vector<8x128xf32> to vector<1x1x8x128xf32>
      tpu.vector_store %arg9[%c0_96, %c0_97, %c0_98, %c0_99], %138 {strides = array<i32>} : memref<1x1x8x128xf32, #tpu.memory_space<vmem>>, vector<1x1x8x128xf32>,
      %cst_100 = arith.constant 0.000000e+00 : f32
      %139 = vector.broadcast %cst_100 : f32 to vector<8x128xf32>
      %c0_101 = arith.constant 0 : index
      %c0_102 = arith.constant 0 : index
      %c0_103 = arith.constant 0 : index
      %c0_104 = arith.constant 0 : index
      %140 = vector.load %arg10[%c0_101, %c0_102, %c0_103, %c0_104] : memref<1x1x8x128xf32, #tpu.memory_space<vmem>>, vector<1x1x8x128xf32>
      %141 = vector.shape_cast %140 : vector<1x1x8x128xf32> to vector<8x128xf32>
      %142 = vector.shape_cast %139 : vector<8x128xf32> to vector<1x1x8x128xf32>
      tpu.vector_store %arg10[%c0_101, %c0_102, %c0_103, %c0_104], %142 {strides = array<i32>} : memref<1x1x8x128xf32, #tpu.memory_space<vmem>>, vector<1x1x8x128xf32>,
    } else {
    }
    %c0 = arith.constant 0 : index
    %c0_1 = arith.constant 0 : index
    %c0_2 = arith.constant 0 : index
    %c0_3 = arith.constant 0 : index
    %3 = vector.load %arg3[%c0, %c0_1, %c0_2, %c0_3] : memref<1x1x8x128xf32, #tpu.memory_space<vmem>>, vector<1x1x8x128xf32>
    %4 = vector.shape_cast %3 : vector<1x1x8x128xf32> to vector<8x128xf32>
    %c0_4 = arith.constant 0 : index
    %c0_5 = arith.constant 0 : index
    %c0_6 = arith.constant 0 : index
    %c0_7 = arith.constant 0 : index
    %5 = vector.load %arg4[%c0_4, %c0_5, %c0_6, %c0_7] : memref<1x1x8x128xf32, #tpu.memory_space<vmem>>, vector<1x1x8x128xf32>
    %6 = vector.shape_cast %5 : vector<1x1x8x128xf32> to vector<8x128xf32>
    %7 = tpu.iota {dimensions = array<i32: 0>} : vector<8x128xi32>
    %8 = tpu.iota {dimensions = array<i32: 1>} : vector<8x128xi32>
    %c8_i32 = arith.constant 8 : i32
    %9 = arith.muli %arg2, %c8_i32 : i32
    %10 = vector.broadcast %9 : i32 to vector<8x128xi32>
    %11 = arith.addi %10, %7 : vector<8x128xi32>
    %c128_i32 = arith.constant 128 : i32
    %12 = vector.broadcast %c128_i32 : i32 to vector<8x128xi32>
    %13 = arith.muli %11, %12 : vector<8x128xi32>
    %14 = arith.addi %13, %8 : vector<8x128xi32>
    %c256_i32 = arith.constant 256 : i32
    %15 = vector.broadcast %c256_i32 : i32 to vector<8x128xi32>
    %16 = arith.cmpi slt, %14, %15 : vector<8x128xi32>
    %17 = arith.extui %16 : vector<8x128xi1> to vector<8x128xi32>
    %18 = arith.sitofp %17 : vector<8x128xi32> to vector<8x128xf32>
    %19 = math.absf %4 : vector<8x128xf32>
    %cst = arith.constant 0.000000e+00 : f32
    %20 = vector.broadcast %cst : f32 to vector<8x128xf32>
    %21 = arith.subf %20, %19 : vector<8x128xf32>
    %22 = math.exp %21 : vector<8x128xf32>
    %cst_8 = arith.constant 1.000000e+00 : f32
    %23 = vector.broadcast %cst_8 : f32 to vector<8x128xf32>
    %24 = arith.addf %23, %22 : vector<8x128xf32>
    %25 = tpu.reciprocal %24 {approx = true} : vector<8x128xf32> -> vector<8x128xf32>
    %cst_9 = arith.constant 0.000000e+00 : f32
    %26 = vector.broadcast %cst_9 : f32 to vector<8x128xf32>
    %27 = arith.cmpf oge, %4, %26 : vector<8x128xf32>
    %28 = arith.mulf %22, %25 : vector<8x128xf32>
    %29 = arith.select %27, %25, %28 : vector<8x128xi1>, vector<8x128xf32>
    %c0_10 = arith.constant 0 : index
    %c0_11 = arith.constant 0 : index
    %c0_12 = arith.constant 0 : index
    %c0_13 = arith.constant 0 : index
    %30 = vector.load %arg5[%c0_10, %c0_11, %c0_12, %c0_13] : memref<1x1x8x128xf32, #tpu.memory_space<vmem>>, vector<1x1x8x128xf32>
    %31 = vector.shape_cast %30 : vector<1x1x8x128xf32> to vector<8x128xf32>
    %32 = arith.mulf %29, %6 : vector<8x128xf32>
    %33 = arith.mulf %32, %18 : vector<8x128xf32>
    %34 = vector.shape_cast %33 : vector<8x128xf32> to vector<1x8x128xf32>
    %cst_14 = arith.constant dense<0.000000e+00> : vector<8x128xf32>
    %35 = vector.multi_reduction <add>, %34, %cst_14 [0] : vector<1x8x128xf32> to vector<8x128xf32>
    %36 = arith.addf %31, %35 : vector<8x128xf32>
    %c0_15 = arith.constant 0 : index
    %c0_16 = arith.constant 0 : index
    %c0_17 = arith.constant 0 : index
    %c0_18 = arith.constant 0 : index
    %37 = vector.load %arg5[%c0_15, %c0_16, %c0_17, %c0_18] : memref<1x1x8x128xf32, #tpu.memory_space<vmem>>, vector<1x1x8x128xf32>
    %38 = vector.shape_cast %37 : vector<1x1x8x128xf32> to vector<8x128xf32>
    %39 = vector.shape_cast %36 : vector<8x128xf32> to vector<1x1x8x128xf32>
    tpu.vector_store %arg5[%c0_15, %c0_16, %c0_17, %c0_18], %39 {strides = array<i32>} : memref<1x1x8x128xf32, #tpu.memory_space<vmem>>, vector<1x1x8x128xf32>,
    %c0_19 = arith.constant 0 : index
    %c0_20 = arith.constant 0 : index
    %c0_21 = arith.constant 0 : index
    %c0_22 = arith.constant 0 : index
    %40 = vector.load %arg6[%c0_19, %c0_20, %c0_21, %c0_22] : memref<1x1x8x128xf32, #tpu.memory_space<vmem>>, vector<1x1x8x128xf32>
    %41 = vector.shape_cast %40 : vector<1x1x8x128xf32> to vector<8x128xf32>
    %42 = arith.mulf %29, %18 : vector<8x128xf32>
    %43 = vector.shape_cast %42 : vector<8x128xf32> to vector<1x8x128xf32>
    %cst_23 = arith.constant dense<0.000000e+00> : vector<8x128xf32>
    %44 = vector.multi_reduction <add>, %43, %cst_23 [0] : vector<1x8x128xf32> to vector<8x128xf32>
    %45 = arith.addf %41, %44 : vector<8x128xf32>
    %c0_24 = arith.constant 0 : index
    %c0_25 = arith.constant 0 : index
    %c0_26 = arith.constant 0 : index
    %c0_27 = arith.constant 0 : index
    %46 = vector.load %arg6[%c0_24, %c0_25, %c0_26, %c0_27] : memref<1x1x8x128xf32, #tpu.memory_space<vmem>>, vector<1x1x8x128xf32>
    %47 = vector.shape_cast %46 : vector<1x1x8x128xf32> to vector<8x128xf32>
    %48 = vector.shape_cast %45 : vector<8x128xf32> to vector<1x1x8x128xf32>
    tpu.vector_store %arg6[%c0_24, %c0_25, %c0_26, %c0_27], %48 {strides = array<i32>} : memref<1x1x8x128xf32, #tpu.memory_space<vmem>>, vector<1x1x8x128xf32>,
    %c0_28 = arith.constant 0 : index
    %c0_29 = arith.constant 0 : index
    %c0_30 = arith.constant 0 : index
    %c0_31 = arith.constant 0 : index
    %49 = vector.load %arg7[%c0_28, %c0_29, %c0_30, %c0_31] : memref<1x1x8x128xf32, #tpu.memory_space<vmem>>, vector<1x1x8x128xf32>
    %50 = vector.shape_cast %49 : vector<1x1x8x128xf32> to vector<8x128xf32>
    %51 = arith.mulf %6, %18 : vector<8x128xf32>
    %52 = vector.shape_cast %51 : vector<8x128xf32> to vector<1x8x128xf32>
    %cst_32 = arith.constant dense<0.000000e+00> : vector<8x128xf32>
    %53 = vector.multi_reduction <add>, %52, %cst_32 [0] : vector<1x8x128xf32> to vector<8x128xf32>
    %54 = arith.addf %50, %53 : vector<8x128xf32>
    %c0_33 = arith.constant 0 : index
    %c0_34 = arith.constant 0 : index
    %c0_35 = arith.constant 0 : index
    %c0_36 = arith.constant 0 : index
    %55 = vector.load %arg7[%c0_33, %c0_34, %c0_35, %c0_36] : memref<1x1x8x128xf32, #tpu.memory_space<vmem>>, vector<1x1x8x128xf32>
    %56 = vector.shape_cast %55 : vector<1x1x8x128xf32> to vector<8x128xf32>
    %57 = vector.shape_cast %54 : vector<8x128xf32> to vector<1x1x8x128xf32>
    tpu.vector_store %arg7[%c0_33, %c0_34, %c0_35, %c0_36], %57 {strides = array<i32>} : memref<1x1x8x128xf32, #tpu.memory_space<vmem>>, vector<1x1x8x128xf32>,
    %cst_37 = arith.constant 0.000000e+00 : f32
    %58 = vector.broadcast %cst_37 : f32 to vector<8x128xf32>
    %59 = arith.maximumf %4, %58 : vector<8x128xf32>
    %60 = arith.mulf %4, %6 : vector<8x128xf32>
    %61 = arith.subf %59, %60 : vector<8x128xf32>
    %cst_38 = arith.constant 1.000000e+00 : f32
    %62 = vector.broadcast %cst_38 : f32 to vector<8x128xf32>
    %63 = arith.addf %62, %22 : vector<8x128xf32>
    %64 = math.log %63 : vector<8x128xf32>
    %65 = arith.addf %61, %64 : vector<8x128xf32>
    %c0_39 = arith.constant 0 : index
    %c0_40 = arith.constant 0 : index
    %c0_41 = arith.constant 0 : index
    %c0_42 = arith.constant 0 : index
    %66 = vector.load %arg8[%c0_39, %c0_40, %c0_41, %c0_42] : memref<1x1x8x128xf32, #tpu.memory_space<vmem>>, vector<1x1x8x128xf32>
    %67 = vector.shape_cast %66 : vector<1x1x8x128xf32> to vector<8x128xf32>
    %68 = arith.mulf %65, %18 : vector<8x128xf32>
    %69 = vector.shape_cast %68 : vector<8x128xf32> to vector<1x8x128xf32>
    %cst_43 = arith.constant dense<0.000000e+00> : vector<8x128xf32>
    %70 = vector.multi_reduction <add>, %69, %cst_43 [0] : vector<1x8x128xf32> to vector<8x128xf32>
    %71 = arith.addf %67, %70 : vector<8x128xf32>
    %c0_44 = arith.constant 0 : index
    %c0_45 = arith.constant 0 : index
    %c0_46 = arith.constant 0 : index
    %c0_47 = arith.constant 0 : index
    %72 = vector.load %arg8[%c0_44, %c0_45, %c0_46, %c0_47] : memref<1x1x8x128xf32, #tpu.memory_space<vmem>>, vector<1x1x8x128xf32>
    %73 = vector.shape_cast %72 : vector<1x1x8x128xf32> to vector<8x128xf32>
    %74 = vector.shape_cast %71 : vector<8x128xf32> to vector<1x1x8x128xf32>
    tpu.vector_store %arg8[%c0_44, %c0_45, %c0_46, %c0_47], %74 {strides = array<i32>} : memref<1x1x8x128xf32, #tpu.memory_space<vmem>>, vector<1x1x8x128xf32>,
    %cst_48 = arith.constant 9.99999993E-9 : f32
    %cst_49 = arith.constant 1.000000e+00 : f32
    %75 = vector.broadcast %cst_48 : f32 to vector<8x128xf32>
    %76 = arith.maximumf %75, %4 : vector<8x128xf32>
    %77 = vector.broadcast %cst_49 : f32 to vector<8x128xf32>
    %78 = arith.minimumf %77, %76 : vector<8x128xf32>
    %cst_50 = arith.constant 9.99999993E-9 : f32
    %cst_51 = arith.constant 1.000000e+00 : f32
    %79 = vector.broadcast %cst_50 : f32 to vector<8x128xf32>
    %80 = arith.maximumf %79, %6 : vector<8x128xf32>
    %81 = vector.broadcast %cst_51 : f32 to vector<8x128xf32>
    %82 = arith.minimumf %81, %80 : vector<8x128xf32>
    %cst_52 = arith.constant 1.000000e+00 : f32
    %83 = vector.broadcast %cst_52 : f32 to vector<8x128xf32>
    %84 = arith.subf %83, %82 : vector<8x128xf32>
    %cst_53 = arith.constant 1.000000e+00 : f32
    %85 = vector.broadcast %cst_53 : f32 to vector<8x128xf32>
    %86 = arith.subf %85, %78 : vector<8x128xf32>
    %87 = arith.mulf %84, %86 : vector<8x128xf32>
    %88 = arith.mulf %82, %78 : vector<8x128xf32>
    %89 = arith.addf %87, %88 : vector<8x128xf32>
    %cst_54 = arith.constant 1.000000e+00 : f32
    %90 = vector.broadcast %cst_54 : f32 to vector<8x128xf32>
    %91 = arith.subf %90, %89 : vector<8x128xf32>
    %92 = arith.mulf %91, %91 : vector<8x128xf32>
    %cst_55 = arith.constant 2.550000e+02 : f32
    %93 = vector.broadcast %cst_55 : f32 to vector<8x128xf32>
    %94 = arith.cmpf one, %6, %93 : vector<8x128xf32>
    %95 = arith.extui %94 : vector<8x128xi1> to vector<8x128xi32>
    %96 = arith.sitofp %95 : vector<8x128xi32> to vector<8x128xf32>
    %97 = arith.mulf %96, %18 : vector<8x128xf32>
    %c0_56 = arith.constant 0 : index
    %c0_57 = arith.constant 0 : index
    %c0_58 = arith.constant 0 : index
    %c0_59 = arith.constant 0 : index
    %98 = vector.load %arg9[%c0_56, %c0_57, %c0_58, %c0_59] : memref<1x1x8x128xf32, #tpu.memory_space<vmem>>, vector<1x1x8x128xf32>
    %99 = vector.shape_cast %98 : vector<1x1x8x128xf32> to vector<8x128xf32>
    %cst_60 = arith.constant 0.000000e+00 : f32
    %100 = vector.broadcast %cst_60 : f32 to vector<8x128xf32>
    %101 = arith.subf %100, %92 : vector<8x128xf32>
    %102 = math.log %89 : vector<8x128xf32>
    %103 = arith.mulf %101, %102 : vector<8x128xf32>
    %104 = arith.mulf %103, %97 : vector<8x128xf32>
    %105 = vector.shape_cast %104 : vector<8x128xf32> to vector<1x8x128xf32>
    %cst_61 = arith.constant dense<0.000000e+00> : vector<8x128xf32>
    %106 = vector.multi_reduction <add>, %105, %cst_61 [0] : vector<1x8x128xf32> to vector<8x128xf32>
    %107 = arith.addf %99, %106 : vector<8x128xf32>
    %c0_62 = arith.constant 0 : index
    %c0_63 = arith.constant 0 : index
    %c0_64 = arith.constant 0 : index
    %c0_65 = arith.constant 0 : index
    %108 = vector.load %arg9[%c0_62, %c0_63, %c0_64, %c0_65] : memref<1x1x8x128xf32, #tpu.memory_space<vmem>>, vector<1x1x8x128xf32>
    %109 = vector.shape_cast %108 : vector<1x1x8x128xf32> to vector<8x128xf32>
    %110 = vector.shape_cast %107 : vector<8x128xf32> to vector<1x1x8x128xf32>
    tpu.vector_store %arg9[%c0_62, %c0_63, %c0_64, %c0_65], %110 {strides = array<i32>} : memref<1x1x8x128xf32, #tpu.memory_space<vmem>>, vector<1x1x8x128xf32>,
    %c0_66 = arith.constant 0 : index
    %c0_67 = arith.constant 0 : index
    %c0_68 = arith.constant 0 : index
    %c0_69 = arith.constant 0 : index
    %111 = vector.load %arg10[%c0_66, %c0_67, %c0_68, %c0_69] : memref<1x1x8x128xf32, #tpu.memory_space<vmem>>, vector<1x1x8x128xf32>
    %112 = vector.shape_cast %111 : vector<1x1x8x128xf32> to vector<8x128xf32>
    %113 = vector.shape_cast %97 : vector<8x128xf32> to vector<1x8x128xf32>
    %cst_70 = arith.constant dense<0.000000e+00> : vector<8x128xf32>
    %114 = vector.multi_reduction <add>, %113, %cst_70 [0] : vector<1x8x128xf32> to vector<8x128xf32>
    %115 = arith.addf %112, %114 : vector<8x128xf32>
    %c0_71 = arith.constant 0 : index
    %c0_72 = arith.constant 0 : index
    %c0_73 = arith.constant 0 : index
    %c0_74 = arith.constant 0 : index
    %116 = vector.load %arg10[%c0_71, %c0_72, %c0_73, %c0_74] : memref<1x1x8x128xf32, #tpu.memory_space<vmem>>, vector<1x1x8x128xf32>
    %117 = vector.shape_cast %116 : vector<1x1x8x128xf32> to vector<8x128xf32>
    %118 = vector.shape_cast %115 : vector<8x128xf32> to vector<1x1x8x128xf32>
    tpu.vector_store %arg10[%c0_71, %c0_72, %c0_73, %c0_74], %118 {strides = array<i32>} : memref<1x1x8x128xf32, #tpu.memory_space<vmem>>, vector<1x1x8x128xf32>,
    return
  }
  func.func @transform_0(%arg0: i32, %arg1: i32, %arg2: i32) -> (i32, i32, i32, i32) {
    %c0_i32 = arith.constant 0 : i32
    %c0_i32_0 = arith.constant 0 : i32
    return %arg1, %arg0, %arg2, %c0_i32 : i32, i32, i32, i32
  }
  func.func @transform_1(%arg0: i32, %arg1: i32, %arg2: i32) -> (i32, i32, i32, i32) {
    %c0_i32 = arith.constant 0 : i32
    %c0_i32_0 = arith.constant 0 : i32
    return %arg1, %arg0, %arg2, %c0_i32 : i32, i32, i32, i32
  }
  func.func @transform_2(%arg0: i32, %arg1: i32, %arg2: i32) -> (i32, i32, i32, i32) {
    %c0_i32 = arith.constant 0 : i32
    %c0_i32_0 = arith.constant 0 : i32
    %c0_i32_1 = arith.constant 0 : i32
    return %arg0, %arg1, %c0_i32, %c0_i32_0 : i32, i32, i32, i32
  }
  func.func @transform_3(%arg0: i32, %arg1: i32, %arg2: i32) -> (i32, i32, i32, i32) {
    %c0_i32 = arith.constant 0 : i32
    %c0_i32_0 = arith.constant 0 : i32
    %c0_i32_1 = arith.constant 0 : i32
    return %arg0, %arg1, %c0_i32, %c0_i32_0 : i32, i32, i32, i32
  }
  func.func @transform_4(%arg0: i32, %arg1: i32, %arg2: i32) -> (i32, i32, i32, i32) {
    %c0_i32 = arith.constant 0 : i32
    %c0_i32_0 = arith.constant 0 : i32
    %c0_i32_1 = arith.constant 0 : i32
    return %arg0, %arg1, %c0_i32, %c0_i32_0 : i32, i32, i32, i32
  }
  func.func @transform_5(%arg0: i32, %arg1: i32, %arg2: i32) -> (i32, i32, i32, i32) {
    %c0_i32 = arith.constant 0 : i32
    %c0_i32_0 = arith.constant 0 : i32
    %c0_i32_1 = arith.constant 0 : i32
    return %arg0, %arg1, %c0_i32, %c0_i32_0 : i32, i32, i32, i32
  }
  func.func @transform_6(%arg0: i32, %arg1: i32, %arg2: i32) -> (i32, i32, i32, i32) {
    %c0_i32 = arith.constant 0 : i32
    %c0_i32_0 = arith.constant 0 : i32
    %c0_i32_1 = arith.constant 0 : i32
    return %arg0, %arg1, %c0_i32, %c0_i32_0 : i32, i32, i32, i32
  }
  func.func @transform_7(%arg0: i32, %arg1: i32, %arg2: i32) -> (i32, i32, i32, i32) {
    %c0_i32 = arith.constant 0 : i32
    %c0_i32_0 = arith.constant 0 : i32
    %c0_i32_1 = arith.constant 0 : i32
    return %arg0, %arg1, %c0_i32, %c0_i32_0 : i32, i32, i32, i32
  }
}

</mosaic_0001>

<bundles_post_ra>
// kernel: tpu_custom_call.1
= control target key start
LH: loop header
LB: loop body
LE: loop exit
PB: predicated region body
PF: predicated region fallthrough
CT: control target
= control target key end

     0   :  { %s1799_s0 = inlined_call_operand.hbm [shape: f32[2,3,8,128], index: 0, kind: input, shape index: {}]   ;;  %s1800_s1 = inlined_call_operand.hbm [shape: f32[2,3,8,128], index: 1, kind: input, shape index: {}]   ;;  %s1801_s2 = inlined_call_operand.hbm [shape: f32[3,2,8,128], index: 2, kind: output, shape index: {0}]   ;;  %s1802_s3 = inlined_call_operand.hbm [shape: f32[3,2,8,128], index: 3, kind: output, shape index: {1}]   ;;  %s1803_s4 = inlined_call_operand.hbm [shape: f32[3,2,8,128], index: 4, kind: output, shape index: {2}]   ;;  %s1804_s5 = inlined_call_operand.hbm [shape: f32[3,2,8,128], index: 5, kind: output, shape index: {3}]   ;;  %s1805_s6 = inlined_call_operand.hbm [shape: f32[3,2,8,128], index: 6, kind: output, shape index: {4}]   ;;  %s1806_s7 = inlined_call_operand.hbm [shape: f32[3,2,8,128], index: 7, kind: output, shape index: {5}]  }
   0x1   :  { %1822 = sst [smem:[#allocation34_spill]] %s1805_s6 }
   0x2   :  { %13 = vsyncpa [#allocation3], 0 }
   0x3   :  { %15 = vsyncpa [#allocation3 + $0x1], 0 }
   0x4   :  { %16 = vsyncpa [#allocation6], 0 }
   0x5   :  { %18 = vsyncpa [#allocation6 + $0x1], 0 }
   0x6   :  { %19 = vsyncpa [#allocation4], 0 }
   0x7   :  { %21 = vsyncpa [#allocation4 + $0x1], 0 }
   0x8   :  { %22 = vsyncpa [#allocation9], 0 }
   0x9   :  { %24 = vsyncpa [#allocation9 + $0x1], 0 }
   0xa   :  { %25 = vsyncpa [#allocation12], 0 }
   0xb   :  { %27 = vsyncpa [#allocation12 + $0x1], 0 }
   0xc   :  { %28 = vsyncpa [#allocation15], 0 }
   0xd   :  { %30 = vsyncpa [#allocation15 + $0x1], 0  ;;  %s1435_s24 = smov 0   ;;  %s1437_s25 = smov 0  }
   0xe   :  { %s1439_s26 = smov 0   ;;  %s1441_s27 = smov 0  }
   0xf   :  { %s1443_s28 = smov 0   ;;  %s1445_s29 = smov 0  }
  0x10   :  { %s1447_s30 = smov 0   ;;  %s1449_s8 = smov 0  }
  0x11 LB: > { %1823 = sst [smem:[#allocation22_spill]] %s1364_s24  ;;  %s1476_s9 = sadd.s32 4294967295, %s1392_s8   ;;  %s1392_s8 = sphi %s1449_s8, %s36_s8   ;;  %s1388_s30 = sphi %s1447_s30, %s1863_s30   ;;  %s1384_s29 = sphi %s1445_s29, %s1862_s29   ;;  %s1380_s28 = sphi %s1443_s28, %s1861_s28   ;;  %s1376_s27 = sphi %s1441_s27, %s1860_s27   ;;  %s1372_s26 = sphi %s1439_s26, %s1866_s26   ;;  %s1368_s25 = sphi %s1437_s25, %s1865_s25   ;;  %s1364_s24 = sphi %s1435_s24, %s1864_s24  }
  0x12   : > { %1824 = sst [smem:[#allocation23_spill]] %s1384_s29  ;;  %s1811_s10 = sadd.s32 4294967294, %s1392_s8  }
  0x13   : > { %1825 = sst [smem:[#allocation24_spill]] %s1388_s30  ;;  %s51_s11 = sadd.s32 1, %s1384_s29 }
  0x14   : > { %s55_s12 = sadd.s32 1, %s1388_s30  ;;  %p53_p0 = scmp.ge.s32.totalorder %s51_s11, 2 }
  0x15   : > { %s66_s13 = sadd.s32 1, %s1372_s26  ;;  %p73_p1 = scmp.ne.s32.totalorder %s1372_s26, %s1368_s25 }
  0x16   : > { %p74_p2 = scmp.eq.s32.totalorder %s1392_s8, 0  ;;  %s1868_s11 = smov (%p53_p0, %s51_s11), 0 }
  0x17   : > { %1826 = sst [smem:[#allocation25_spill]] %s1868_s11  ;;  %s1870_s12 = smov (!%p53_p0, %s55_s12), %s1388_s30 }
  0x18   : > { %s59_s14 = ssub.s32 %s1384_s29, %s1868_s11  ;;  %p1490_p3 = por %p74_p2, %p73_p1 }
  0x19   : > { %p57_p4 = scmp.ge.s32.totalorder %s1870_s12, 3  ;;  %p79_p5 = scmp.ne.s32.totalorder %s1368_s25, %s1364_s24 }
  0x1a   : > { %p80_p6 = scmp.eq.s32.totalorder %s1476_s9, 0  ;;  %p135_p7 = scmp.eq.s32.totalorder %s1476_s9, 5 }
  0x1b   : > { %s1872_s12 = smov (%p57_p4, %s1870_s12), 0  ;;  %p141_p10 = scmp.eq.s32.totalorder %s1811_s10, 5 }
  0x1c   : > { %1828 = sst [smem:[#allocation26_spill]] %s1872_s12  ;;  %p1500_p8 = por %p80_p6, %p79_p5 }
  0x1d   : > { %p1504_p9 = por %p135_p7, %p73_p1  ;;  %s60_s18 = ssub.s32 %s1388_s30, %s1872_s12 }
  0x1e   : > { %s61_s19 = sor.u32 %s60_s18, %s59_s14  ;;  %p1512_p12 = por %p141_p10, %p79_p5 }
  0x1f   : > { %p64_p11 = scmp.eq.s32.totalorder %s61_s19, 0  ;;  %p1003_p13 = scmp.lt.s32.totalorder %s1392_s8, 6 }
  0x20   : > { %s1831_s20 = scalar_select %p1512_p12, 1, 0 }
  0x21   : > { %s301_s21 = sand.u32 1, %s1372_s26   ;;  %s959_s11 = smul.u32 3, %s1384_s29 }
  0x22   : > { %1832 = sst [smem:[#allocation27_spill]] %s1831_s20  ;;  %s924_s23 = sshll.u32 %s301_s21, 3 }
  0x23   : > { %s1519_s22 = scalar_select %p64_p11, %s1372_s26, %s66_s13  }
  0x24   : > { %s305_s24 = scalar_lea.vmem [#allocation2], %s924_s23  ;;  %p1524_p0 = pnand %p1003_p13, %p1490_p3 }
  0x25   : > { %1833 = sst [smem:[#allocation28_spill]] %s1519_s22  ;;  %s316_s6 = sshll.u32 %s305_s24, 4  ;;  %s317_s6 = int_to_ptr.vmem [resolvable:$true] %s316_s6 }
  0x26   : > { %s310_s14 = sadd.s32 %s1388_s30, %s959_s11  ;;  %p928_p1 = scmp.ge.s32.totalorder %s1392_s8, 1 }
  0x27   : > { %s925_s18 = sshll.u32 %s310_s14, 3  ;;  %p343_p2 = scmp.lt.s32.totalorder %s1392_s8, 7 }
  0x28   : > { %s312_s20 = scalar_lea.hbm %s1799_s0, %s925_s18  ;;  %s302_s29 = scalar_lea.sflag [#allocation3], %s301_s21 }
  0x29   : > { %s314_s13 = sshll.u32 %s312_s20, 4  ;;  %p344_p3 = pnand %p928_p1, %p343_p2  ;;  %s315_s13 = int_to_ptr.hbm [resolvable:$true] %s314_s13 }
  0x2a   : > { %980 = dma.hbm_to_vmem [thread:$0]  (!%p1524_p0), %s315_s13, 128, %s317_s6, %s302_s29  }
  0x2b   : > { %s334_s22 = scalar_lea.hbm %s1800_s1, %s925_s18  ;;  %s327_s11 = scalar_lea.vmem [#allocation5], %s924_s23 }
  0x2c   : > { %s338_s30 = sshll.u32 %s327_s11, 4  ;;  %s336_s14 = sshll.u32 %s334_s22, 4  ;;  %s339_s30 = int_to_ptr.vmem [resolvable:$true] %s338_s30  ;;  %s337_s14 = int_to_ptr.hbm [resolvable:$true] %s336_s14 }
  0x2d   : > { %s324_s10 = scalar_lea.sflag [#allocation6], %s301_s21  ;;  %347 = sbr.rel (%p344_p3) target bundleno = 156 (0x9c), region = 28 }
  0x2e   : > { %983 = dma.hbm_to_vmem [thread:$0]  (!%p1524_p0), %s337_s14, 128, %s339_s30, %s324_s10  }
  0x32   : > { %s1542_s20 = sand.u32 1, %s1368_s25  }
  0x33   : > { %s1545_s6 = sshll.u32 %s1542_s20, 3  ;;  %s350_s29 = scalar_lea.sflag [#allocation3], %s1542_s20 }
  0x34   : > { %s353_s18 = scalar_lea.vmem [#allocation2], %s1545_s6 }
  0x35   : > { %1339 = dma.done.wait (%p1500_p8), %s350_s29, 128  }
  0x36   : > { %1341 = vsyncadd (%p1500_p8), %s350_s29, 4294967168  ;;  %s360_s30 = scalar_lea.sflag [#allocation6], %s1542_s20  ;;  %s363_s12 = scalar_lea.vmem [#allocation5], %s1545_s6 }
  0x37   : > { %1343 = dma.done.wait (%p1500_p8), %s360_s30, 128  }
  0x38   : > { %1345 = vsyncadd (%p1500_p8), %s360_s30, 4294967168  ;;  %v437_v0 = vlaneseq  ;;  %v1559_v5 = vld [vmem:[%s353_s18] sm:$0xff]  ;;  %v1561_v6 = vld [vmem:[%s363_s12] sm:$0xff]  ;;  %v1394_v8 = vmov 0.0   ;;  %s945_s16 = sshll.u32 %s1380_s28, 1  ;;  %s403_s22 = scalar_lea.vmem [#allocation10], %s1545_s6 }
  0x39   : > { %v449_v7 = vand.u32 2147483647, %v1559_v5  ;;  %v485_v10 = vmax.f32 %v1559_v5, 1e-08  ;;  %v487_v11 = vmax.f32 %v1561_v6, 1e-08  ;;  %s549_s21 = sadd.s32 %s1376_s27, %s945_s16 }
  0x3a   : > { %v438_v1 = vshrl.u32 %v437_v0, 7  ;;  %v440_v2 = vand.u32 127, %v437_v0  ;;  %vm496_vm1 = vcmp.ne.f32.partialorder %v1561_v6, 255.0  ;;  %s424_s23 = scalar_lea.vmem [#allocation14], %s1545_s6  ;;  %s1581_s28 = sshll.u32 %s549_s21, 3 }
  0x3b   : > { %v450_v12 = vsub.f32 0.0, %v449_v7  ;;  %v486_v14 = vmin.f32 %v485_v10, 1.0  ;;  %v488_v15 = vmin.f32 %v487_v11, 1.0  ;;  %v938_v16 = vsel %vm496_vm1, 1.0, %v1394_v8  ;;  %s631_s27 = scalar_lea.hbm %s1806_s7, %s1581_s28  ;;  %s633_s24 = sshll.u32 %s424_s23, 4  ;;  %s634_s24 = int_to_ptr.vmem [resolvable:$true] %s633_s24 }
  0x3c   : > { %v444_v3 = vmul.u32 128, %v438_v1  ;;  %s635_s15 = sshll.u32 %s631_s27, 4  ;;  %s539_s11 = scalar_lea.sflag [#allocation15], %s1542_s20  ;;  %s636_s15 = int_to_ptr.hbm [resolvable:$true] %s635_s15 }
  0x3d   : > { %v451_v17 = vmul.f32 1.442695, %v450_v12  ;;  %v489_v19 = vsub.f32 1.0, %v488_v15  ;;  %v490_v20 = vsub.f32 1.0, %v486_v14  ;;  %v492_v21 = vmul.f32 %v488_v15, %v486_v14  ;;  %s1152_s14 = sshra.s32 %s636_s15, 4  ;;  %s1158_s30 = scalar_lea.hbm %s1806_s7, 48  ;;  %s1153_s14 = int_to_ptr.hbm [resolvable:$true] %s1152_s14 }
  0x3e   : > { %v445_v4 = vadd.s32 %v444_v3, %v440_v2  ;;  %s1154_s10 = scalar_lea.hbm %s1153_s14, 8  ;;  %p1159_p7 = scmp.lt.s32.totalorder %s1153_s14, %s1806_s7 }
  0x3f   : > { %1070 = vpow2.f32 %v451_v17  ;;  %v491_v22 = vmul.f32 %v490_v20, %v489_v19  ;;  %p1155_p4 = scmp.ne.s32.totalorder %s1153_s14, %s1154_s10  ;;  %p1160_p8 = scmp.lt.s32.totalorder %s1158_s30, %s1154_s10 }
  0x40   : > { %vm446_vm0 = vcmp.lt.s32.totalorder %v445_v4, 256 }
  0x41   : > { %v1564_v9 = vsel %vm446_vm0, 1.0, %v1394_v8  ;;  %v493_v23 = vadd.f32 %v492_v21, %v491_v22  ;;  %p1156_p5 = pnand %p1155_p4, %p1504_p9  ;;  %p1161_p10 = por %p1160_p8, %p1159_p7 }
  0x42   : > { %v470_v13 = vmul.f32 %v1564_v9, %v1561_v6  ;;  %v1573_v18 = vmul.f32 %v938_v16, %v1564_v9 }
  0x43   : > { %v494_v24 = vsub.f32 1.0, %v493_v23  ;;  %1072 = vlog2.f32 %v493_v23  ;;  %p1157_p6 = pneg %p1156_p5 }
  0x44   : > { %473 = vst [vmem:[%s403_s22] sm:$0xff] %v470_v13 }
  0x45   : > { %512 = vst [vmem:[%s424_s23] sm:$0xff] %v1573_v18  ;;  %v1071_v25 = vpop.eup %1070  ;;  %v495_v27 = vmul.f32 %v494_v24, %v494_v24  ;;  %p1162_p11 = pnand %p1161_p10, %p1157_p6 }
  0x46   : > { %v453_v26 = vadd.f32 1.0, %v1071_v25 }
  0x47   : > { %1165 = shalt.err (!%p1162_p11)
}
  0x48   : > { %970 = dma.vmem_to_hbm [thread:$0]  (%p1504_p9), %s634_s24, 128, %s636_s15, %s539_s11   ;;  %1074 = vrcp.f32 %v453_v26  ;;  %v501_v28 = vsub.f32 0.0, %v495_v27  ;;  %v474_v30 = vmax.f32 %v1559_v5, 0.0  ;;  %v475_v31 = vmul.f32 %v1561_v6, %v1559_v5 }
  0x49   : > { %s1600_s21 = sshll.u32 %s403_s22, 4  ;;  %s567_s13 = scalar_lea.hbm %s1802_s3, %s1581_s28  ;;  %1076 = vlog2.f32 %v453_v26  ;;  %v1073_v29 = vpop.eup %1072  ;;  %vm455_vm2 = vcmp.ge.f32.partialorder %v1559_v5, 0.0 }
  0x4a   : > { %1835 = sst [smem:[#allocation29_spill]] %s1600_s21  ;;  %s417_s27 = scalar_lea.vmem [#allocation13], %s1545_s6  ;;  %v503_v32 = vmul.f32 0.6931472, %v1073_v29  ;;  %v476_v35 = vsub.f32 %v474_v30, %v475_v31 }
  0x4b   : > { %s1609_s14 = sshll.u32 %s417_s27, 4  ;;  %s1819_s22 = scalar_lea.vmem [#allocation8], %s1545_s6 }
  0x4c   : > { %1836 = sst [smem:[#allocation30_spill]] %s1609_s14  ;;  %s1618_s24 = sshll.u32 %s1819_s22, 4  ;;  %v504_v33 = vmul.f32 %v503_v32, %v501_v28 }
  0x4d   : > { %1837 = sst [smem:[#allocation31_spill]] %s1618_s24  ;;  %s1621_s15 = sshll.u32 %s567_s13, 4  ;;  %s572_s15 = int_to_ptr.hbm [resolvable:$true] %s1621_s15 }
  0x4e   : > { %s599_s18 = scalar_lea.hbm %s1804_s5, %s1581_s28  ;;  %v1075_v34 = vpop.eup %1074  ;;  %s1818_s30 = scalar_lea.vmem [#allocation11], %s1545_s6  ;;  %v505_v38 = vmul.f32 %v504_v33, %v1573_v18 }
  0x4f   : > { %s1634_s12 = sshll.u32 %s1818_s30, 4  ;;  %v1077_v36 = vpop.eup %1076  ;;  %v456_v37 = vmul.f32 %v1075_v34, %v1071_v25  ;;  %s583_s19 = scalar_lea.hbm %s1803_s4, %s1581_s28 }
  0x50   : > { %1838 = sst [smem:[#allocation32_spill]] %s1634_s12  ;;  %v478_v39 = vmul.f32 0.6931472, %v1077_v36  ;;  %s551_s29 = scalar_lea.hbm %s1801_s2, %s1581_s28  ;;  %508 = vst [vmem:[%s417_s27] sm:$0xff] %v505_v38 }
  0x51   : > { %s1839_s24 = sld [smem:[#allocation34_spill]]  ;;  %v457_v40 = vsel %vm455_vm2, %v1075_v34, %v456_v37  ;;  %s1650_s22 = sshll.u32 %s599_s18, 4  ;;  %s604_s22 = int_to_ptr.hbm [resolvable:$true] %s1650_s22 }
  0x52   : > { %v465_v41 = vmul.f32 %v1564_v9, %v457_v40  ;;  %v479_v42 = vadd.f32 %v478_v39, %v476_v35  ;;  %v459_v43 = vmul.f32 %v457_v40, %v1561_v6  ;;  %s389_s16 = scalar_lea.vmem [#allocation7], %s1545_s6  ;;  %s1659_s21 = sshll.u32 %s583_s19, 4  ;;  %s588_s21 = int_to_ptr.hbm [resolvable:$true] %s1659_s21 }
  0x53   : > { %s1657_s23 = sshll.u32 %s389_s16, 4  ;;  %s1843_s18 = sand.u32 1, %s1476_s9  }
  0x54   : > { %1841 = sst [smem:[#allocation33_spill]] %s1657_s23  ;;  %v481_v44 = vmul.f32 %v1564_v9, %v479_v42  ;;  %v460_v45 = vmul.f32 %v1564_v9, %v459_v43  ;;  %s519_s27 = scalar_lea.sflag [#allocation9], %s1843_s18 }
  0x55   : > { %s1180_s19 = sshra.s32 %s572_s15, 4  ;;  %s1181_s19 = int_to_ptr.hbm [resolvable:$true] %s1180_s19 }
  0x56   : > { %s1182_s13 = scalar_lea.hbm %s1181_s19, 8  ;;  %p1187_p2 = scmp.lt.s32.totalorder %s1181_s19, %s1802_s3 }
  0x57   : > { %s1840_s10 = smov %s1839_s24  ;;  %s615_s30 = scalar_lea.hbm %s1839_s24, %s1581_s28 }
  0x58   : > { %s1663_s28 = sshll.u32 %s551_s29, 4  ;;  %s1665_s14 = sshll.u32 %s615_s30, 4  ;;  %s556_s28 = int_to_ptr.hbm [resolvable:$true] %s1663_s28  ;;  %s620_s14 = int_to_ptr.hbm [resolvable:$true] %s1665_s14 }
  0x59   : > { %s1842_s24 = scalar_lea.vmem [#allocation8], %s1545_s6  ;;  %p1183_p13 = scmp.ne.s32.totalorder %s1181_s19, %s1182_s13 }
  0x5a   : > { %468 = vst [vmem:[%s1842_s24] sm:$0xff] %v465_v41  ;;  %s1186_s29 = scalar_lea.hbm %s1802_s3, 48 }
  0x5b   : > { %p1184_p0 = pnand %p1183_p13, %p1504_p9  ;;  %p1188_p3 = scmp.lt.s32.totalorder %s1186_s29, %s1182_s13 }
  0x5d   : > { %p1185_p1 = pneg %p1184_p0  ;;  %p1189_p4 = por %p1188_p3, %p1187_p2 }
  0x5f   : > { %p1190_p5 = pnand %p1189_p4, %p1185_p1 }
  0x61   : > { %1193 = shalt.err (!%p1190_p5)
}
  0x62   : > { %s1844_s24 = sld [smem:[#allocation31_spill]]  ;;  %s1846_s30 = scalar_lea.vmem [#allocation11], %s1545_s6 }
  0x63   : > { %484 = vst [vmem:[%s1846_s30] sm:$0xff] %v481_v44  ;;  %s1208_s11 = sshra.s32 %s588_s21, 4  ;;  %s1214_s13 = scalar_lea.hbm %s1803_s4, 48  ;;  %s1209_s11 = int_to_ptr.hbm [resolvable:$true] %s1208_s11 }
  0x64   : > { %s1210_s12 = scalar_lea.hbm %s1209_s11, 8  ;;  %p1215_p10 = scmp.lt.s32.totalorder %s1209_s11, %s1803_s4 }
  0x65   : > { %p1211_p6 = scmp.ne.s32.totalorder %s1209_s11, %s1210_s12  ;;  %p1216_p11 = scmp.lt.s32.totalorder %s1214_s13, %s1210_s12 }
  0x67   : > { %p1212_p7 = pnand %p1211_p6, %p1504_p9  ;;  %p1217_p13 = por %p1216_p11, %p1215_p10 }
  0x68   : > { %s1845_s18 = int_to_ptr.vmem [resolvable:$true] %s1844_s24 }
  0x69   : > { %966 = dma.vmem_to_hbm [thread:$0]  (%p1504_p9), %s1845_s18, 128, %s572_s15, %s519_s27  }
  0x6a   : > { %p1213_p8 = pneg %p1212_p7 }
  0x6c   : > { %p1218_p0 = pnand %p1217_p13, %p1213_p8 }
  0x6e   : > { %1221 = shalt.err (!%p1218_p0)
}
  0x6f   : > { %s1847_s15 = sld [smem:[#allocation29_spill]]  ;;  %463 = vst [vmem:[%s389_s16] sm:$0xff] %v460_v45  ;;  %s1849_s30 = sand.u32 1, %s1476_s9  }
  0x70   : > { %s1716_s23 = scalar_lea.sflag [#allocation12], %s1849_s30  ;;  %s1236_s11 = sshra.s32 %s604_s22, 4  ;;  %s1237_s11 = int_to_ptr.hbm [resolvable:$true] %s1236_s11 }
  0x71   : > { %s1238_s12 = scalar_lea.hbm %s1237_s11, 8  ;;  %s1242_s29 = scalar_lea.hbm %s1804_s5, 48 }
  0x72   : > { %p1239_p1 = scmp.ne.s32.totalorder %s1237_s11, %s1238_s12  ;;  %p1243_p4 = scmp.lt.s32.totalorder %s1237_s11, %s1804_s5 }
  0x73   : > { %p1244_p5 = scmp.lt.s32.totalorder %s1242_s29, %s1238_s12 }
  0x74   : > { %p1240_p2 = pnand %p1239_p1, %p1504_p9 }
  0x75   : > { %s1848_s18 = int_to_ptr.vmem [resolvable:$true] %s1847_s15  ;;  %p1245_p6 = por %p1244_p5, %p1243_p4 }
  0x76   : > { %967 = dma.vmem_to_hbm [thread:$0]  (%p1504_p9), %s1848_s18, 128, %s588_s21, %s519_s27  }
  0x77   : > { %p1241_p3 = pneg %p1240_p2 }
  0x79   : > { %p1246_p7 = pnand %p1245_p6, %p1241_p3 }
  0x7b   : > { %1249 = shalt.err (!%p1246_p7)
}
  0x7c   : > { %s1850_s9 = sld [smem:[#allocation32_spill]]  ;;  %s514_s16 = scalar_lea.sflag [#allocation4], %s1542_s20 }
  0x7d   : > { %s1264_s21 = sshra.s32 %s556_s28, 4  ;;  %s1270_s11 = scalar_lea.hbm %s1801_s2, 48  ;;  %s1265_s21 = int_to_ptr.hbm [resolvable:$true] %s1264_s21 }
  0x7e   : > { %s1266_s27 = scalar_lea.hbm %s1265_s21, 8  ;;  %p1271_p13 = scmp.lt.s32.totalorder %s1265_s21, %s1801_s2 }
  0x7f   : > { %p1267_p8 = scmp.ne.s32.totalorder %s1265_s21, %s1266_s27  ;;  %p1272_p0 = scmp.lt.s32.totalorder %s1270_s11, %s1266_s27 }
  0x81   : > { %p1268_p10 = pnand %p1267_p8, %p1504_p9  ;;  %p1273_p1 = por %p1272_p0, %p1271_p13 }
  0x82   : > { %s1851_s6 = int_to_ptr.vmem [resolvable:$true] %s1850_s9 }
  0x83   : > { %968 = dma.vmem_to_hbm [thread:$0]  (%p1504_p9), %s1851_s6, 128, %s604_s22, %s1716_s23  }
  0x84   : > { %p1269_p11 = pneg %p1268_p10 }
  0x86   : > { %p1274_p2 = pnand %p1273_p1, %p1269_p11 }
  0x88   : > { %1277 = shalt.err (!%p1274_p2)
}
  0x89   : > { %s1852_s20 = sld [smem:[#allocation33_spill]]  ;;  %s1292_s13 = sshra.s32 %s620_s14, 4  ;;  %s1293_s13 = int_to_ptr.hbm [resolvable:$true] %s1292_s13 }
  0x8a   : > { %s1294_s29 = scalar_lea.hbm %s1293_s13, 8  ;;  %s1298_s9 = scalar_lea.hbm %s1840_s10, 48 }
  0x8b   : > { %p1295_p3 = scmp.ne.s32.totalorder %s1293_s13, %s1294_s29  ;;  %p1299_p6 = scmp.lt.s32.totalorder %s1293_s13, %s1840_s10 }
  0x8c   : > { %p1300_p7 = scmp.lt.s32.totalorder %s1298_s9, %s1294_s29 }
  0x8d   : > { %p1296_p4 = pnand %p1295_p3, %p1504_p9 }
  0x8e   : > { %p1301_p8 = por %p1300_p7, %p1299_p6 }
  0x8f   : > { %s1853_s22 = int_to_ptr.vmem [resolvable:$true] %s1852_s20  ;;  %p1297_p5 = pneg %p1296_p4 }
  0x90   : > { %965 = dma.vmem_to_hbm [thread:$0]  (%p1504_p9), %s1853_s22, 128, %s556_s28, %s514_s16  }
  0x91   : > { %p1302_p10 = pnand %p1301_p8, %p1297_p5 }
  0x93   : > { %1305 = shalt.err (!%p1302_p10)
}
  0x94   : > { %s1854_s28 = sld [smem:[#allocation30_spill]] }
  0x9a   : > { %s1855_s16 = int_to_ptr.vmem [resolvable:$true] %s1854_s28 }
  0x9b   : > { %969 = dma.vmem_to_hbm [thread:$0]  (%p1504_p9), %s1855_s16, 128, %s620_s14, %s1716_s23  }
  0x9c PF: > { %s1856_s27 = sld [smem:[#allocation22_spill]]  ;;  %p1004_p11 = scmp.ge.s32.totalorder %s1392_s8, 2 }
  0x9e   : > { %p985_p13 = pnand %p1004_p11, %p1512_p12 }
  0xa0   : > { %p986_p0 = pneg %p985_p13 }
  0xa2   : > { %s647_s30 = sand.u32 1, %s1856_s27  }
  0xa3   : > { %s648_s11 = scalar_lea.sflag [#allocation4], %s647_s30 }
  0xa4   : > { %1347 = dma.done.wait (%p986_p0), %s648_s11, 128  }
  0xa5   : > { %1349 = vsyncadd (%p986_p0), %s648_s11, 4294967168  ;;  %s1858_s17 = sadd.s32 4294967294, %s1392_s8  }
  0xa6   : > { %s657_s12 = sand.u32 1, %s1858_s17  }
  0xa7   : > { %s658_s19 = scalar_lea.sflag [#allocation9], %s657_s12 }
  0xa8   : > { %1351 = dma.done.wait (%p986_p0), %s658_s19, 256  }
  0xa9   : > { %1353 = vsyncadd (%p986_p0), %s658_s19, 4294967040  ;;  %s678_s20 = scalar_lea.sflag [#allocation12], %s657_s12 }
  0xaa   : > { %1355 = dma.done.wait (%p986_p0), %s678_s20, 256  }
  0xab   : > { %1357 = vsyncadd (%p986_p0), %s678_s20, 4294967040  ;;  %s698_s14 = scalar_lea.sflag [#allocation15], %s647_s30 }
  0xac   : > { %1359 = dma.done.wait (%p986_p0), %s698_s14, 128  }
  0xad   : > { %1361 = vsyncadd (%p986_p0), %s698_s14, 4294967168  ;;  %s36_s8 = sadd.s32 1, %s1392_s8   ;;  %s1859_s23 = sld [smem:[#allocation28_spill]] }
  0xae   : > { %p33_p9 = scmp.ge.s32.totalorder %s36_s8, 8   ;;  %s1860_s27 = sld [smem:[#allocation23_spill]] }
  0xaf   : > { %s1861_s28 = sld [smem:[#allocation24_spill]]  ;;  %s1864_s24 = smov %s1368_s25 }
  0xb0   : > { %s1862_s29 = sld [smem:[#allocation25_spill]]  ;;  %s1865_s25 = smov %s1372_s26 }
  0xb1   : > { %s1863_s30 = sld [smem:[#allocation26_spill]]  ;;  %35 = sbr.rel (!%p33_p9) target bundleno = 17 (0x11), region = 171 }
  0xb3   : > { %s1866_s26 = smov %s1859_s23 }
  0xb6   :  { %704 = vsyncpa [#allocation3], 1 }
  0xb7   :  { %706 = vsyncpa [#allocation3 + $0x1], 1 }
  0xb8   :  { %707 = vsyncpa [#allocation6], 1 }
  0xb9   :  { %709 = vsyncpa [#allocation6 + $0x1], 1 }
  0xba   :  { %710 = vsyncpa [#allocation4], 1 }
  0xbb   :  { %712 = vsyncpa [#allocation4 + $0x1], 1 }
  0xbc   :  { %713 = vsyncpa [#allocation9], 1 }
  0xbd   :  { %715 = vsyncpa [#allocation9 + $0x1], 1 }
  0xbe   :  { %716 = vsyncpa [#allocation12], 1 }
  0xbf   :  { %718 = vsyncpa [#allocation12 + $0x1], 1 }
  0xc0   :  { %719 = vsyncpa [#allocation15], 1 }
  0xc1   :  { %721 = vsyncpa [#allocation15 + $0x1], 1 }

</bundles_post_ra>
